<compile_context>
chip_gen: v7x
topology: tpu7x:2x2x1
jax: 0.10.0
libtpu: 0.0.40
codegen_flags: <defaults>
</compile_context>

<pallas_src>
import functools

import jax
import jax.numpy as jnp
from jax.experimental import pallas as pl
from jax.experimental.pallas import tpu as pltpu

_MIB = 1 << 20


# ---------------------------------------------------------------------------
# Hardware / sizing helpers
# ---------------------------------------------------------------------------
def _tpu_hw_info():
    """Best-effort (vmem_capacity_bytes, has_two_tensorcores)."""
    vmem_cap = 64 * _MIB  # conservative default (v7x per-core VMEM)
    two_tc = False
    try:
        info = pltpu.get_tpu_info()
        cap = getattr(info, "vmem_capacity_bytes", None)
        if cap:
            vmem_cap = int(cap)
    except Exception:
        pass
    try:
        dk = jax.devices()[0].device_kind.lower()
        two_tc = ("v7" in dk) or ("tpu7" in dk)
    except Exception:
        pass
    return vmem_cap, two_tc


def _vmem_limit_bytes(resident_bytes, vmem_cap):
    """Scoped-VMEM limit: big enough for the working set, well under physical."""
    limit = max(int(resident_bytes) + 4 * _MIB, 32 * _MIB)
    return int(min(limit, vmem_cap - 2 * _MIB))


# ---------------------------------------------------------------------------
# Path A: the whole H*W axis fits in one block; tile over batch only.
# ---------------------------------------------------------------------------
def _norm_full_kernel(x_ref, o_ref, *, eps, inv_n, inv_nm1):
    x = x_ref[...].astype(jnp.float32)                       # (tb, HW)
    mean = jnp.sum(x, axis=-1, keepdims=True) * inv_n
    diff = x - mean
    # Two-pass (centered) variance: avoids sum-of-squares cancellation when
    # |mean| >> std (plausible for un-centered spectrogram features).
    var = jnp.sum(diff * diff, axis=-1, keepdims=True) * inv_nm1
    # One reciprocal per sample; the big elementwise pass stays on the VPU.
    inv = pl.reciprocal(jnp.sqrt(var) + eps, approx=False)
    o_ref[...] = (diff * inv).astype(o_ref.dtype)


# ---------------------------------------------------------------------------
# Path B: H*W too large for one block -- chunk the feature axis.
# ---------------------------------------------------------------------------
def _stats_kernel(x_ref, mean_ref, inv_ref, sum_sc, sq_sc, shift_sc, *,
                  eps, hw, chunk, inv_n, inv_nm1):
    c = pl.program_id(1)
    x = x_ref[...].astype(jnp.float32)                       # (tb, ck)

    @pl.when(c == 0)
    def _():
        # Chunk 0 is never ragged; its per-row mean is the shift that keeps
        # the fused sum / sum-of-squares numerically stable.
        shift_sc[...] = jnp.sum(x, axis=-1, keepdims=True) * (1.0 / chunk)
        sum_sc[...] = jnp.zeros(sum_sc.shape, sum_sc.dtype)
        sq_sc[...] = jnp.zeros(sq_sc.shape, sq_sc.dtype)

    # Mask out-of-range columns of the ragged last chunk.
    col = c * chunk + jax.lax.broadcasted_iota(jnp.int32, x.shape, 1)
    d = jnp.where(col < hw, x - shift_sc[...], 0.0)
    sum_sc[...] += jnp.sum(d, axis=-1, keepdims=True)
    sq_sc[...] += jnp.sum(d * d, axis=-1, keepdims=True)

    @pl.when(c == pl.num_programs(1) - 1)
    def _():
        s = sum_sc[...]
        mean_shifted = s * inv_n
        var = jnp.maximum((sq_sc[...] - s * mean_shifted) * inv_nm1, 0.0)
        mean_ref[...] = shift_sc[...] + mean_shifted
        inv_ref[...] = pl.reciprocal(jnp.sqrt(var) + eps, approx=False)


def _apply_kernel(x_ref, mean_ref, inv_ref, o_ref):
    x = x_ref[...].astype(jnp.float32)
    o_ref[...] = ((x - mean_ref[...]) * inv_ref[...]).astype(o_ref.dtype)


def _mean_std_norm_chunked(x2, *, eps, inv_n, inv_nm1, tb, ck, vmem_limit):
    B, HW = x2.shape
    grid = (pl.cdiv(B, tb), pl.cdiv(HW, ck))

    mean, inv = pl.pallas_call(
        functools.partial(_stats_kernel, eps=eps, hw=HW, chunk=ck,
                          inv_n=inv_n, inv_nm1=inv_nm1),
        out_shape=(jax.ShapeDtypeStruct((B, 1), jnp.float32),
                   jax.ShapeDtypeStruct((B, 1), jnp.float32)),
        grid=grid,
        in_specs=[pl.BlockSpec((tb, ck), lambda b, c: (b, c))],
        out_specs=(pl.BlockSpec((tb, 1), lambda b, c: (b, 0)),
                   pl.BlockSpec((tb, 1), lambda b, c: (b, 0))),
        scratch_shapes=[pltpu.VMEM((tb, 1), jnp.float32),
                        pltpu.VMEM((tb, 1), jnp.float32),
                        pltpu.VMEM((tb, 1), jnp.float32)],
        compiler_params=pltpu.CompilerParams(
            dimension_semantics=("parallel", "arbitrary"),
            vmem_limit_bytes=vmem_limit),
    )(x2)

    return pl.pallas_call(
        _apply_kernel,
        out_shape=jax.ShapeDtypeStruct((B, HW), x2.dtype),
        grid=grid,
        in_specs=[pl.BlockSpec((tb, ck), lambda b, c: (b, c)),
                  pl.BlockSpec((tb, 1), lambda b, c: (b, 0)),
                  pl.BlockSpec((tb, 1), lambda b, c: (b, 0))],
        out_specs=pl.BlockSpec((tb, ck), lambda b, c: (b, c)),
        compiler_params=pltpu.CompilerParams(
            dimension_semantics=("parallel", "arbitrary"),
            vmem_limit_bytes=vmem_limit),
    )(x2, mean, inv)


# ---------------------------------------------------------------------------
# Public wrapper
# ---------------------------------------------------------------------------
def mean_std_norm(x, eps=1e-6, *, target_block_bytes=None, batch_tile=None):
    """Pallas equivalent of MeanStdNorm.forward for x of shape (B, H, W).

    `target_block_bytes` / `batch_tile` are tuning/testing overrides.
    """
    B, H, W = x.shape
    HW = H * W
    n_elem = float(HW)
    inv_n = 1.0 / n_elem
    # TODO(synk): torch.std(ddof=1) yields NaN when H*W == 1; we clamp 1/(n-1)
    # instead of reproducing the NaN.
    inv_nm1 = 1.0 / max(n_elem - 1.0, 1.0)

    itemsize = jnp.dtype(x.dtype).itemsize
    per_sample_bytes = HW * itemsize
    x2 = x.reshape(B, HW)                        # free, row-major contiguous

    vmem_cap, two_tc = _tpu_hw_info()
    # Residency per byte of block: 2x double-buffered input + 2x double-buffered
    # output, plus f32 temporaries (diff; plus the f32 copy of x when the input
    # dtype is narrower than f32).
    n_f32_tmp = 1 if itemsize == 4 else 2
    per_unit = 4.0 + n_f32_tmp * (4.0 / itemsize)
    headroom = 2 * _MIB
    budget = min(max(vmem_cap // 2 - 4 * _MIB, 16 * _MIB), 48 * _MIB)
    if two_tc:
        budget = min(budget, 24 * _MIB)          # v7x: 64 MiB VMEM per core
    block_target = min(8 * _MIB, int((budget - headroom) / per_unit))
    if target_block_bytes is not None:
        block_target = int(target_block_bytes)

    min_tb = B if B <= 8 else 8                  # smallest layout-valid batch tile

    if per_sample_bytes * min_tb <= block_target:
        # --- Path A: one block spans the whole sample ------------------------
        if batch_tile is not None:
            tb = int(batch_tile)
        else:
            tb = min(B, max(1, block_target // per_sample_bytes))
            if two_tc and B >= 16:
                tb = min(tb, pl.cdiv(B, 2))      # give the 2nd TensorCore work
            if tb < B:
                tb = max(8, (tb // 8) * 8)       # keep the sublane dim aligned
                if tb >= B:
                    tb = B
        block_bytes = tb * per_sample_bytes
        vmem_limit = _vmem_limit_bytes(per_unit * block_bytes + headroom, vmem_cap)

        out2 = pl.pallas_call(
            functools.partial(_norm_full_kernel, eps=eps, inv_n=inv_n,
                              inv_nm1=inv_nm1),
            out_shape=jax.ShapeDtypeStruct((B, HW), x.dtype),
            grid=(pl.cdiv(B, tb),),
            in_specs=[pl.BlockSpec((tb, HW), lambda b: (b, 0))],
            out_specs=pl.BlockSpec((tb, HW), lambda b: (b, 0)),
            compiler_params=pltpu.CompilerParams(
                dimension_semantics=("parallel",),
                vmem_limit_bytes=vmem_limit),
        )(x2)
    else:
        # --- Path B: chunk the H*W axis (huge per-sample inputs) -------------
        tb = min_tb if batch_tile is None else int(batch_tile)
        if HW <= 128:
            ck = HW
        else:
            ck_budget = max(1, block_target // max(tb * itemsize, 1))
            ck = max(128, min((ck_budget // 128) * 128, (HW // 128) * 128))
        block_bytes = tb * ck * itemsize
        vmem_limit = _vmem_limit_bytes(per_unit * block_bytes + headroom, vmem_cap)
        out2 = _mean_std_norm_chunked(x2, eps=eps, inv_n=inv_n, inv_nm1=inv_nm1,
                                      tb=tb, ck=ck, vmem_limit=vmem_limit)

    return out2.reshape(B, H, W)


# ---------------------------------------------------------------------------
# Reference + self-test
# ---------------------------------------------------------------------------
def _reference(x, eps=1e-6):
    """Plain-JAX reference mirroring the PyTorch forward."""
    x32 = x.astype(jnp.float32)
    mean = jnp.mean(x32, axis=(1, 2), keepdims=True)
    std = jnp.std(x32.reshape(x.shape[0], -1), axis=1, ddof=1)[:, None, None]
    return ((x32 - mean) / (std + eps)).astype(x.dtype)


if __name__ == "__main__":
    key = jax.random.PRNGKey(0)
    k1, k2, k3 = jax.random.split(key, 3)

    # 1) Default path A (whole sample in one lane-dense block).
    x1 = jax.random.normal(k1, (2, 16, 128), dtype=jnp.float32) * 3.0 + 1.5
    o1 = jax.block_until_ready(mean_std_norm(x1))
    assert o1.shape == x1.shape and o1.dtype == x1.dtype
    assert jnp.allclose(o1, _reference(x1), atol=1e-4, rtol=1e-4)

    # 2) Path A with a ragged last batch tile (grid = cdiv(10, 8) = 2) and a
    #    non-multiple-of-128 feature count (HW = 1600).
    x2 = jax.random.normal(k2, (10, 16, 100), dtype=jnp.float32) * 2.0 - 0.7
    o2 = jax.block_until_ready(mean_std_norm(x2, batch_tile=8))
    assert jnp.allclose(o2, _reference(x2), atol=1e-4, rtol=1e-4)

    # 3) Chunked fallback path (forced tiny block budget): multiple H*W chunks
    #    with a ragged, masked last chunk.
    x3 = jax.random.normal(k3, (3, 16, 100), dtype=jnp.float32) * 4.0 + 10.0
    o3 = jax.block_until_ready(mean_std_norm(x3, target_block_bytes=4096))
    assert jnp.allclose(o3, _reference(x3), atol=1e-4, rtol=1e-4)

    print("KERNEL_OK")
</pallas_src>

<mosaic_0001>
module attributes {stable_mosaic.version = 11 : i64} {
  func.func @_norm_full_kernel(%arg0: i32, %arg1: memref<2x2048xf32, #tpu.memory_space<vmem>>, %arg2: memref<2x2048xf32, #tpu.memory_space<vmem>>) attributes {dimension_semantics = [#tpu.dimension_semantics<parallel>], iteration_bounds = array<i64: 1>, scalar_prefetch = 0 : i64, scratch_operands = 0 : i64, tpu.core_type = #tpu.core_type<tc>, window_params = [{transform_indices = @transform_0, window_bounds = array<i64: 2, 2048>}, {transform_indices = @transform_1, window_bounds = array<i64: 2, 2048>}]} {
    %c0 = arith.constant 0 : index
    %c0_0 = arith.constant 0 : index
    %0 = vector.load %arg1[%c0, %c0_0] : memref<2x2048xf32, #tpu.memory_space<vmem>>, vector<2x2048xf32>
    %cst = arith.constant dense<0.000000e+00> : vector<2xf32>
    %1 = vector.multi_reduction <add>, %0, %cst [1] : vector<2x2048xf32> to vector<2xf32>
    %2 = vector.shape_cast %1 : vector<2xf32> to vector<2x1xf32>
    %cst_1 = arith.constant 4.8828125E-4 : f32
    %3 = vector.broadcast %cst_1 : f32 to vector<2x1xf32>
    %4 = arith.mulf %2, %3 : vector<2x1xf32>
    %5 = vector.broadcast %4 : vector<2x1xf32> to vector<2x2048xf32>
    %6 = arith.subf %0, %5 : vector<2x2048xf32>
    %7 = arith.mulf %6, %6 : vector<2x2048xf32>
    %cst_2 = arith.constant dense<0.000000e+00> : vector<2xf32>
    %8 = vector.multi_reduction <add>, %7, %cst_2 [1] : vector<2x2048xf32> to vector<2xf32>
    %9 = vector.shape_cast %8 : vector<2xf32> to vector<2x1xf32>
    %cst_3 = arith.constant 4.88519785E-4 : f32
    %10 = vector.broadcast %cst_3 : f32 to vector<2x1xf32>
    %11 = arith.mulf %9, %10 : vector<2x1xf32>
    %12 = math.sqrt %11 : vector<2x1xf32>
    %cst_4 = arith.constant 9.99999997E-7 : f32
    %13 = vector.broadcast %cst_4 : f32 to vector<2x1xf32>
    %14 = arith.addf %12, %13 : vector<2x1xf32>
    %15 = tpu.reciprocal %14 : vector<2x1xf32> -> vector<2x1xf32>
    %16 = vector.broadcast %15 : vector<2x1xf32> to vector<2x2048xf32>
    %17 = arith.mulf %6, %16 : vector<2x2048xf32>
    %c0_5 = arith.constant 0 : index
    %c0_6 = arith.constant 0 : index
    %18 = vector.load %arg2[%c0_5, %c0_6] : memref<2x2048xf32, #tpu.memory_space<vmem>>, vector<2x2048xf32>
    tpu.vector_store %arg2[%c0_5, %c0_6], %17 {strides = array<i32>} : memref<2x2048xf32, #tpu.memory_space<vmem>>, vector<2x2048xf32>,
    return
  }
  func.func @transform_0(%arg0: i32) -> (i32, i32) {
    %c0_i32 = arith.constant 0 : i32
    %c0_i32_0 = arith.constant 0 : i32
    return %arg0, %c0_i32 : i32, i32
  }
  func.func @transform_1(%arg0: i32) -> (i32, i32) {
    %c0_i32 = arith.constant 0 : i32
    %c0_i32_0 = arith.constant 0 : i32
    return %arg0, %c0_i32 : i32, i32
  }
}

</mosaic_0001>

<bundles_post_ra>
// kernel: tpu_custom_call.1
= control target key start
LH: loop header
LB: loop body
LE: loop exit
PB: predicated region body
PF: predicated region fallthrough
CT: control target
= control target key end

     0   :  { %6 = vsyncpa [#allocation3], 0  ;;  %s511_s0 = inlined_call_operand.hbm [shape: f32[2,2048], index: 0, kind: input, shape index: {}]   ;;  %s512_s1 = inlined_call_operand.hbm [shape: f32[2,2048], index: 1, kind: output, shape index: {}]  }
   0x1   :  { %7 = vsyncpa [#allocation4], 0  ;;  %s388_s6 = smov [#allocation2]   ;;  %s340_s10 = scalar_lea.hbm %s511_s0, 512 }
   0x2   :  { %s14_s7 = sshll.u32 %s388_s6, 4  ;;  %p341_p0 = scmp.ne.s32.totalorder %s511_s0, %s340_s10  ;;  %s15_s7 = int_to_ptr.vmem [resolvable:$true] %s14_s7 }
   0x3   :  { %p344_p1 = scmp.lt.u32.totalorder %s340_s10, %s511_s0 }
   0x5   :  { %p346_p2 = pnand %p344_p1, %p341_p0 }
   0x7   :  { %349 = shalt.err (!%p346_p2)
}
   0x8   :  { %s350_s15 = scalar_lea.vmem %s15_s7, 512  ;;  %p355_p4 = scmp.lt.s32.totalorder %s15_s7, %s15_s7 }
   0x9   :  { %p351_p3 = scmp.ne.s32.totalorder %s15_s7, %s350_s15  ;;  %p356_p5 = scmp.lt.s32.totalorder %s350_s15, %s350_s15 }
   0xb   :  { %p357_p6 = por %p356_p5, %p355_p4 }
   0xd   :  { %p358_p7 = pnand %p357_p6, %p351_p3 }
   0xf   :  { %361 = shalt.err (!%p358_p7)
}
  0x10   :  { %17 = dma.hbm_to_vmem [thread:$0]  %s511_s0, 512, %s15_s7, [#allocation3]  }
  0x11   :  { %384 = dma.done.wait [#allocation3], 512  }
  0x12   :  { %385 = vsyncadd [#allocation3], 4294966784  ;;  %v33_v0 = vlaneseq  ;;  %v389_v1 = vmov 1983009808   ;;  %v419_v6 = vld [vmem:[#allocation2] sm:$0xff]  ;;  %v421_v7 = vld [vmem:[#allocation2 + $0x8] sm:$0xff] }
  0x13   :  { %v31_v2 = vunpack.c.l.s4 %v389_v1  ;;  %v29_v8 = vcombine.high %v419_v6, %v419_v6  ;;  %vm113_vm0 = vcmask 1041408   ;;  %v46_v12 = vcombine.high %v421_v7, %v421_v7  ;;  %v23_v22 = vld [vmem:[#allocation2 + $0x10] sm:$0xff]  ;;  %v24_v36 = vld [vmem:[#allocation2 + $0x18] sm:$0xff]  ;;  %s391_s0 = smov [#allocation5]  }
  0x14   :  { %v414_v3 = vshrl.u32 %v33_v0, 7  ;;  %v63_v27 = vcombine.high %v23_v22, %v23_v22  ;;  %v80_v41 = vcombine.high %v24_v36, %v24_v36  ;;  %v390_v61 = vmov 269488144   ;;  %s319_s18 = sshll.u32 %s391_s0, 4  ;;  %s320_s18 = int_to_ptr.vmem [resolvable:$true] %s319_s18 }
  0x15   :  { %v32_v4 = vunpack.c.0.s8 %v31_v2  ;;  %v150_v62 = vunpack.c.l.s4 %v390_v61  ;;  %s362_s19 = scalar_lea.vmem %s320_s18, 512  ;;  %p367_p9 = scmp.lt.s32.totalorder %s320_s18, %s320_s18 }
  0x16   :  { %p363_p8 = scmp.ne.s32.totalorder %s320_s18, %s362_s19  ;;  %p368_p10 = scmp.lt.s32.totalorder %s362_s19, %s362_s19 }
  0x17   :  { %v417_v5 = vsub.s32 %v32_v4, %v414_v3  ;;  %v151_v63 = vunpack.c.0.s8 %v150_v62 }
  0x18   :  { %p369_p11 = por %p368_p10, %p367_p9 }
  0x19   :  { %v36_v9 = vrot.slane %v419_v6, %v417_v5  ;;  %v43_v10 = vrot.slane %v29_v8, %v417_v5  ;;  %v53_v13 = vrot.slane %v421_v7, %v417_v5  ;;  %v60_v19 = vrot.slane %v46_v12, %v417_v5 }
  0x1a   :  { %v70_v28 = vrot.slane %v23_v22, %v417_v5  ;;  %v77_v33 = vrot.slane %v63_v27, %v417_v5  ;;  %v87_v42 = vrot.slane %v24_v36, %v417_v5  ;;  %v94_v47 = vrot.slane %v80_v41, %v417_v5  ;;  %p370_p12 = pnand %p369_p11, %p363_p8 }
  0x1b   :  { %v44_v11 = vcombine.high %v36_v9, %v36_v9  ;;  %v45_v14 = vcombine.high %v43_v10, %v43_v10  ;;  %v114_v15 = vsel %vm113_vm0, %v36_v9, 0.0  ;;  %v117_v18 = vsel %vm113_vm0, %v43_v10, 0.0 }
  0x1c   :  { %v61_v20 = vcombine.high %v53_v13, %v53_v13  ;;  %v121_v24 = vsel %vm113_vm0, %v53_v13, 0.0  ;;  %v62_v26 = vcombine.high %v60_v19, %v60_v19  ;;  %v125_v31 = vsel %vm113_vm0, %v60_v19, 0.0 }
  0x1d   :  { %v115_v16 = vsel %vm113_vm0, %v44_v11, 0.0  ;;  %v119_v21 = vsel %vm113_vm0, %v45_v14, 0.0  ;;  %v78_v34 = vcombine.high %v70_v28, %v70_v28  ;;  %v129_v38 = vsel %vm113_vm0, %v70_v28, 0.0 }
  0x1e   :  { %v116_v17 = vadd.f32 %v115_v16, %v114_v15  ;;  %v123_v29 = vsel %vm113_vm0, %v61_v20, 0.0  ;;  %v127_v35 = vsel %vm113_vm0, %v62_v26, 0.0  ;;  %v79_v40 = vcombine.high %v77_v33, %v77_v33 }
  0x1f   :  { %v131_v43 = vsel %vm113_vm0, %v78_v34, 0.0  ;;  %v133_v45 = vsel %vm113_vm0, %v77_v33, 0.0  ;;  %v95_v48 = vcombine.high %v87_v42, %v87_v42  ;;  %v137_v51 = vsel %vm113_vm0, %v87_v42, 0.0 }
  0x20   :  { %v118_v23 = vadd.f32 %v117_v18, %v116_v17  ;;  %v135_v49 = vsel %vm113_vm0, %v79_v40, 0.0  ;;  %v96_v53 = vcombine.high %v94_v47, %v94_v47  ;;  %v141_v56 = vsel %vm113_vm0, %v94_v47, 0.0 }
  0x21   :  { %v139_v54 = vsel %vm113_vm0, %v95_v48, 0.0  ;;  %v454_v0 = vsub.s32 %v151_v63, %v414_v3 }
  0x22   :  { %v120_v25 = vadd.f32 %v119_v21, %v118_v23  ;;  %v143_v58 = vsel %vm113_vm0, %v96_v53, 0.0 }
  0x24   :  { %v122_v30 = vadd.f32 %v121_v24, %v120_v25 }
  0x26   :  { %v124_v32 = vadd.f32 %v123_v29, %v122_v30 }
  0x28   :  { %v126_v37 = vadd.f32 %v125_v31, %v124_v32 }
  0x2a   :  { %v128_v39 = vadd.f32 %v127_v35, %v126_v37 }
  0x2c   :  { %v130_v44 = vadd.f32 %v129_v38, %v128_v39 }
  0x2e   :  { %v132_v46 = vadd.f32 %v131_v43, %v130_v44 }
  0x30   :  { %v134_v50 = vadd.f32 %v133_v45, %v132_v46 }
  0x32   :  { %v136_v52 = vadd.f32 %v135_v49, %v134_v50 }
  0x34   :  { %v138_v55 = vadd.f32 %v137_v51, %v136_v52 }
  0x36   :  { %v140_v57 = vadd.f32 %v139_v54, %v138_v55 }
  0x38   :  { %v142_v59 = vadd.f32 %v141_v56, %v140_v57 }
  0x3a   :  { %v144_v60 = vadd.f32 %v143_v58, %v142_v59 }
  0x3c   :  { %145 = vadd.xlane.f32.xlu0 %v144_v60 }
  0xc9   :  { %v146_v1 = vpop.xlane.xlu0 %145 }
  0xca   :  { %v147_v2 = vmul.f32 0.00048828125, %v146_v1 }
  0xcc   :  { %v155_v4 = vrot.slane %v147_v2, %v454_v0 }
  0xce   :  { %v458_v8 = vsub.f32 %v419_v6, %v155_v4  ;;  %v461_v9 = vsub.f32 %v421_v7, %v155_v4  ;;  %v469_v15 = vsub.f32 %v23_v22, %v155_v4  ;;  %v160_v28 = vsub.f32 %v24_v36, %v155_v4 }
  0xd0   :  { %v161_v10 = vmul.f32 %v458_v8, %v458_v8  ;;  %v162_v11 = vmul.f32 %v461_v9, %v461_v9  ;;  %v163_v23 = vmul.f32 %v469_v15, %v469_v15  ;;  %v164_v38 = vmul.f32 %v160_v28, %v160_v28 }
  0xd2   :  { %v169_v12 = vcombine.high %v161_v10, %v161_v10  ;;  %v176_v3 = vrot.slane %v161_v10, %v417_v5  ;;  %v186_v16 = vcombine.high %v162_v11, %v162_v11  ;;  %v193_v17 = vrot.slane %v162_v11, %v417_v5 }
  0xd3   :  { %v203_v31 = vcombine.high %v163_v23, %v163_v23  ;;  %v210_v32 = vrot.slane %v163_v23, %v417_v5  ;;  %v220_v45 = vcombine.high %v164_v38, %v164_v38  ;;  %v227_v46 = vrot.slane %v164_v38, %v417_v5 }
  0xd4   :  { %v183_v13 = vrot.slane %v169_v12, %v417_v5  ;;  %v184_v14 = vcombine.high %v176_v3, %v176_v3  ;;  %v253_v7 = vsel %vm113_vm0, %v176_v3, 0.0  ;;  %v200_v24 = vrot.slane %v186_v16, %v417_v5 }
  0xd5   :  { %v201_v25 = vcombine.high %v193_v17, %v193_v17  ;;  %v260_v27 = vsel %vm113_vm0, %v193_v17, 0.0  ;;  %v217_v39 = vrot.slane %v203_v31, %v417_v5  ;;  %v218_v40 = vcombine.high %v210_v32, %v210_v32 }
  0xd6   :  { %v185_v6 = vcombine.high %v183_v13, %v183_v13  ;;  %v254_v18 = vsel %vm113_vm0, %v184_v14, 0.0  ;;  %v256_v20 = vsel %vm113_vm0, %v183_v13, 0.0  ;;  %v202_v30 = vcombine.high %v200_v24, %v200_v24 }
  0xd7   :  { %v255_v19 = vadd.f32 %v254_v18, %v253_v7  ;;  %v262_v33 = vsel %vm113_vm0, %v201_v25, 0.0  ;;  %v264_v35 = vsel %vm113_vm0, %v200_v24, 0.0  ;;  %v268_v36 = vsel %vm113_vm0, %v210_v32, 0.0 }
  0xd8   :  { %v258_v22 = vsel %vm113_vm0, %v185_v6, 0.0  ;;  %v266_v41 = vsel %vm113_vm0, %v202_v30, 0.0  ;;  %v219_v44 = vcombine.high %v217_v39, %v217_v39  ;;  %v270_v47 = vsel %vm113_vm0, %v218_v40, 0.0 }
  0xd9   :  { %v257_v21 = vadd.f32 %v256_v20, %v255_v19  ;;  %v272_v49 = vsel %vm113_vm0, %v217_v39, 0.0  ;;  %v234_v51 = vrot.slane %v220_v45, %v417_v5  ;;  %v235_v52 = vcombine.high %v227_v46, %v227_v46 }
  0xda   :  { %v274_v53 = vsel %vm113_vm0, %v219_v44, 0.0  ;;  %v276_v55 = vsel %vm113_vm0, %v227_v46, 0.0 }
  0xdb   :  { %v259_v26 = vadd.f32 %v258_v22, %v257_v21  ;;  %v236_v57 = vcombine.high %v234_v51, %v234_v51  ;;  %v278_v58 = vsel %vm113_vm0, %v235_v52, 0.0  ;;  %v280_v60 = vsel %vm113_vm0, %v234_v51, 0.0 }
  0xdd   :  { %v261_v29 = vadd.f32 %v260_v27, %v259_v26  ;;  %v282_v62 = vsel %vm113_vm0, %v236_v57, 0.0 }
  0xdf   :  { %v263_v34 = vadd.f32 %v262_v33, %v261_v29 }
  0xe1   :  { %v265_v37 = vadd.f32 %v264_v35, %v263_v34 }
  0xe3   :  { %v267_v42 = vadd.f32 %v266_v41, %v265_v37 }
  0xe5   :  { %v269_v43 = vadd.f32 %v268_v36, %v267_v42 }
  0xe7   :  { %v271_v48 = vadd.f32 %v270_v47, %v269_v43 }
  0xe9   :  { %v273_v50 = vadd.f32 %v272_v49, %v271_v48 }
  0xeb   :  { %v275_v54 = vadd.f32 %v274_v53, %v273_v50 }
  0xed   :  { %v277_v56 = vadd.f32 %v276_v55, %v275_v54 }
  0xef   :  { %v279_v59 = vadd.f32 %v278_v58, %v277_v56 }
  0xf1   :  { %v281_v61 = vadd.f32 %v280_v60, %v279_v59 }
  0xf3   :  { %v283_v63 = vadd.f32 %v282_v62, %v281_v61 }
  0xf5   :  { %284 = vadd.xlane.f32.xlu0 %v283_v63 }
 0x182   :  { %v285_v1 = vpop.xlane.xlu0 %284 }
 0x183   :  { %v286_v5 = vmul.f32 0.0004885198, %v285_v1 }
 0x185   :  { %336 = vrsqrt.f32 %v286_v5  ;;  %vm289_vm1 = vcmp.eq.f32.partialorder %v286_v5, inf  ;;  %v292_v10 = vand.u32 2147483648, %v286_v5  ;;  %vm291_vm2 = vcmp.eq.f32.partialorder %v286_v5, 0.0 }
 0x18f   :  { %v337_v2 = vpop.eup %336 }
 0x190   :  { %v288_v4 = vmul.f32 %v337_v2, %v286_v5 }
 0x192   :  { %v290_v11 = vsel %vm289_vm1, %v286_v5, %v288_v4 }
 0x193   :  { %v293_v12 = vsel %vm291_vm2, %v292_v10, %v290_v11 }
 0x194   :  { %v294_v3 = vadd.f32 1e-06, %v293_v12 }
 0x196   :  { %338 = vrcp.f32 %v294_v3 }
 0x1a0   :  { %v339_v13 = vpop.eup %338 }
 0x1a1   :  { %v303_v14 = vrot.slane %v339_v13, %v454_v0 }
 0x1a3   :  { %v305_v16 = vmul.f32 %v303_v14, %v458_v8  ;;  %v306_v6 = vmul.f32 %v303_v14, %v461_v9  ;;  %v307_v17 = vmul.f32 %v303_v14, %v469_v15  ;;  %v308_v7 = vmul.f32 %v303_v14, %v160_v28 }
 0x1a5   :  { %309 = vst [vmem:[#allocation5] sm:$0xff] %v305_v16  ;;  %310 = vst [vmem:[#allocation5 + $0x8] sm:$0xff] %v306_v6 }
 0x1a6   :  { %311 = vst [vmem:[#allocation5 + $0x10] sm:$0xff] %v307_v17  ;;  %312 = vst [vmem:[#allocation5 + $0x18] sm:$0xff] %v308_v7 }
 0x1a7   :  { %373 = shalt.err (!%p370_p12)
}
 0x1a8   :  { %s374_s22 = scalar_lea.hbm %s512_s1, 512 }
 0x1a9   :  { %p375_p13 = scmp.ne.s32.totalorder %s512_s1, %s374_s22  ;;  %p378_p0 = scmp.lt.u32.totalorder %s374_s22, %s512_s1 }
 0x1ab   :  { %p380_p1 = pnand %p378_p0, %p375_p13 }
 0x1ad   :  { %383 = shalt.err (!%p380_p1)
}
 0x1ae   :  { %322 = dma.vmem_to_hbm [thread:$0]  %s320_s18, 512, %s512_s1, [#allocation4]  }
 0x1af   :  { %386 = dma.done.wait [#allocation4], 512  }
 0x1b0   :  { %387 = vsyncadd [#allocation4], 4294966784 }
 0x1b1   :  { %326 = vsyncpa [#allocation3], 1 }
 0x1b2   :  { %327 = vsyncpa [#allocation4], 1 }

</bundles_post_ra>
